<compile_context>
chip_gen: v5e
topology: v5e:2x2
jax: 0.10.0
libtpu: 0.0.40
codegen_flags: <defaults>
</compile_context>

<pallas_src>
import functools

import jax
import jax.numpy as jnp
from jax.experimental import pallas as pl
from jax.experimental.pallas import tpu as pltpu

IGNORE_INDEX = 255
_UNROLL_MAX_C = 64                    # unroll channel loop for typical segmentation class counts
_TARGET_BLOCK_BYTES = 4 * 1024 * 1024  # ~4 MiB logits block per grid step


def _ce2d_kernel(x_ref, t_ref, sum_ref, cnt_ref, *,
                 num_classes, num_pix, tile_pix, ignore_index):
    """One (C, TILE_PIX) logits tile: per-pixel -log_softmax[target], masked by
    ignore_index (and the ragged tail), reduced to a per-block (sum, count) pair."""
    j = pl.program_id(1)  # pixel-block index

    x = x_ref[0]                       # (C, TILE_PIX): channels on sublanes, pixels on lanes
    if x.dtype != jnp.float32:
        x = x.astype(jnp.float32)
    t = t_ref[0]                       # (1, TILE_PIX) int32 targets

    valid = t != ignore_index          # (1, TILE_PIX) bool
    if num_pix % tile_pix != 0:
        # Mask the ragged tail block in-kernel (no jnp.pad pass over HBM).
        lane = jax.lax.broadcasted_iota(jnp.int32, t.shape, 1)
        valid = valid & ((j * tile_pix + lane) < num_pix)

    if num_classes <= _UNROLL_MAX_C:
        # Channel reduction unrolled over static sublane slices -> stays on the VPU.
        m = x[0:1, :]
        for k in range(1, num_classes):
            m = jnp.maximum(m, x[k:k + 1, :])
        s = jnp.exp(x[0:1, :] - m)
        picked = jnp.where(t == 0, x[0:1, :], 0.0)
        for k in range(1, num_classes):
            xk = x[k:k + 1, :]
            s = s + jnp.exp(xk - m)
            picked = picked + jnp.where(t == k, xk, 0.0)
    else:
        # Fallback for large class counts: vectorized cross-sublane reduce.
        m = jnp.max(x, axis=0, keepdims=True)
        s = jnp.sum(jnp.exp(x - m), axis=0, keepdims=True)
        c_iota = jax.lax.broadcasted_iota(jnp.int32, x.shape, 0)
        picked = jnp.sum(jnp.where(c_iota == t, x, 0.0), axis=0, keepdims=True)

    lse = m + jnp.log(s)                                   # (1, TILE_PIX) logsumexp
    loss = jnp.where(valid, lse - picked, 0.0)             # -log_softmax[target], masked

    block_sum = jnp.sum(loss)                              # one lane-reduce per multi-MB block
    block_cnt = jnp.sum(valid.astype(jnp.float32))

    # Write the scalar partials into element [0, 0] of an (8, 128)-aligned output tile.
    r = jax.lax.broadcasted_iota(jnp.int32, (8, 128), 0)
    c = jax.lax.broadcasted_iota(jnp.int32, (8, 128), 1)
    at00 = (r == 0) & (c == 0)
    sum_ref[...] = jnp.where(at00, block_sum, 0.0)
    cnt_ref[...] = jnp.where(at00, block_cnt, 0.0)


@functools.partial(jax.jit, static_argnames=("tile_pix",))
def cross_entropy_loss_2d(inputs, targets, *, tile_pix=None):
    """inputs: (N, C, H, W) float logits; targets: (N, H, W) int (255 = ignore).
    Returns scalar mean cross-entropy over non-ignored pixels."""
    N, C, H, W = inputs.shape
    HW = H * W

    # Reshape only (contiguous, no transpose): channels -> sublanes, pixels -> lanes.
    x = inputs.reshape(N, C, HW)
    t = targets.reshape(N, 1, HW).astype(jnp.int32)

    if tile_pix is None:
        bytes_per_pix = C * x.dtype.itemsize
        tile_pix = max(128, (_TARGET_BLOCK_BYTES // bytes_per_pix) // 128 * 128)
        tile_pix = min(tile_pix, HW)   # if smaller than HW it stays a multiple of 128
    num_blocks = pl.cdiv(HW, tile_pix)

    # Double-buffered working set (logits + targets) plus slack; explicit so the
    # scoped-VMEM default on any generation never silently shrinks buffering.
    block_bytes = C * tile_pix * x.dtype.itemsize + tile_pix * 4
    vmem_limit = int(min(48 * 2**20, max(2 * block_bytes + (2 << 20), 16 * 2**20)))

    kernel = functools.partial(
        _ce2d_kernel,
        num_classes=C, num_pix=HW, tile_pix=tile_pix, ignore_index=IGNORE_INDEX)

    sums, cnts = pl.pallas_call(
        kernel,
        out_shape=(
            jax.ShapeDtypeStruct((8 * N, 128 * num_blocks), jnp.float32),
            jax.ShapeDtypeStruct((8 * N, 128 * num_blocks), jnp.float32),
        ),
        grid_spec=pltpu.PrefetchScalarGridSpec(
            num_scalar_prefetch=0,
            grid=(N, num_blocks),
            in_specs=[
                pl.BlockSpec((1, C, tile_pix), lambda n, j: (n, 0, j)),   # logits
                pl.BlockSpec((1, 1, tile_pix), lambda n, j: (n, 0, j)),   # targets
            ],
            out_specs=[
                pl.BlockSpec((8, 128), lambda n, j: (n, j)),              # partial sums
                pl.BlockSpec((8, 128), lambda n, j: (n, j)),              # partial counts
            ],
        ),
        compiler_params=pltpu.CompilerParams(
            dimension_semantics=("parallel", "parallel"),  # no carried state -> megacore-friendly
            vmem_limit_bytes=vmem_limit,
        ),
    )(x, t)

    # Final tiny reduction + mean over non-ignored pixels (size_average=True, weight=None).
    # Note: if every pixel is ignore_index the count is 0 and this yields nan, matching PyTorch.
    return jnp.sum(sums) / jnp.sum(cnts)


def _reference(inputs, targets):
    logp = jax.nn.log_softmax(inputs.astype(jnp.float32), axis=1)   # (N, C, H, W)
    onehot = jax.nn.one_hot(targets, inputs.shape[1], axis=1)       # (N, C, H, W)
    picked = jnp.sum(logp * onehot, axis=1)                         # (N, H, W)
    valid = (targets != IGNORE_INDEX).astype(jnp.float32)
    return jnp.sum(-picked * valid) / jnp.sum(valid)


if __name__ == "__main__":
    key = jax.random.PRNGKey(0)
    k1, k2, k3 = jax.random.split(key, 3)

    N, C, H, W = 2, 4, 16, 16
    inputs = jax.random.normal(k1, (N, C, H, W), dtype=jnp.float32)
    targets = jax.random.randint(k2, (N, H, W), 0, C, dtype=jnp.int32)
    # sprinkle some ignored pixels (ignore_index = 255)
    ignore_mask = jax.random.bernoulli(k3, 0.1, (N, H, W))
    targets = jnp.where(ignore_mask, IGNORE_INDEX, targets)

    loss = cross_entropy_loss_2d(inputs, targets)
    loss = jax.block_until_ready(loss)

    ref = _reference(inputs, targets)
    assert jnp.allclose(loss, ref, rtol=1e-5, atol=1e-5), (loss, ref)

    print("KERNEL_OK")
</pallas_src>

<mosaic_0001>
module attributes {stable_mosaic.version = 11 : i64} {
  func.func @_ce2d_kernel(%arg0: i32, %arg1: i32, %arg2: memref<1x4x256xf32, #tpu.memory_space<vmem>>, %arg3: memref<1x1x256xi32, #tpu.memory_space<vmem>>, %arg4: memref<8x128xf32, #tpu.memory_space<vmem>>, %arg5: memref<8x128xf32, #tpu.memory_space<vmem>>) attributes {dimension_semantics = [#tpu.dimension_semantics<parallel>, #tpu.dimension_semantics<parallel>], iteration_bounds = array<i64: 2, 1>, scalar_prefetch = 0 : i64, scratch_operands = 0 : i64, tpu.core_type = #tpu.core_type<tc>, window_params = [{transform_indices = @transform_0, window_bounds = array<i64: 1, 4, 256>}, {transform_indices = @transform_1, window_bounds = array<i64: 1, 1, 256>}, {transform_indices = @transform_2, window_bounds = array<i64: 8, 128>}, {transform_indices = @transform_3, window_bounds = array<i64: 8, 128>}]} {
    %c0 = arith.constant 0 : index
    %c0_0 = arith.constant 0 : index
    %c0_1 = arith.constant 0 : index
    %0 = vector.load %arg2[%c0, %c0_0, %c0_1] : memref<1x4x256xf32, #tpu.memory_space<vmem>>, vector<1x4x256xf32>
    %1 = vector.shape_cast %0 : vector<1x4x256xf32> to vector<4x256xf32>
    %c0_2 = arith.constant 0 : index
    %c0_3 = arith.constant 0 : index
    %c0_4 = arith.constant 0 : index
    %2 = vector.load %arg3[%c0_2, %c0_3, %c0_4] : memref<1x1x256xi32, #tpu.memory_space<vmem>>, vector<1x1x256xi32>
    %3 = vector.shape_cast %2 : vector<1x1x256xi32> to vector<1x256xi32>
    %c255_i32 = arith.constant 255 : i32
    %4 = vector.broadcast %c255_i32 : i32 to vector<1x256xi32>
    %5 = arith.cmpi ne, %3, %4 : vector<1x256xi32>
    %6 = vector.extract_strided_slice %1 {offsets = [0, 0], sizes = [1, 256], strides = [1, 1]} : vector<4x256xf32> to vector<1x256xf32>
    %7 = vector.extract_strided_slice %1 {offsets = [1, 0], sizes = [1, 256], strides = [1, 1]} : vector<4x256xf32> to vector<1x256xf32>
    %8 = arith.maximumf %6, %7 : vector<1x256xf32>
    %9 = vector.extract_strided_slice %1 {offsets = [2, 0], sizes = [1, 256], strides = [1, 1]} : vector<4x256xf32> to vector<1x256xf32>
    %10 = arith.maximumf %8, %9 : vector<1x256xf32>
    %11 = vector.extract_strided_slice %1 {offsets = [3, 0], sizes = [1, 256], strides = [1, 1]} : vector<4x256xf32> to vector<1x256xf32>
    %12 = arith.maximumf %10, %11 : vector<1x256xf32>
    %13 = vector.extract_strided_slice %1 {offsets = [0, 0], sizes = [1, 256], strides = [1, 1]} : vector<4x256xf32> to vector<1x256xf32>
    %14 = arith.subf %13, %12 : vector<1x256xf32>
    %15 = math.exp %14 : vector<1x256xf32>
    %c0_i32 = arith.constant 0 : i32
    %16 = vector.broadcast %c0_i32 : i32 to vector<1x256xi32>
    %17 = arith.cmpi eq, %3, %16 : vector<1x256xi32>
    %18 = vector.extract_strided_slice %1 {offsets = [0, 0], sizes = [1, 256], strides = [1, 1]} : vector<4x256xf32> to vector<1x256xf32>
    %cst = arith.constant 0.000000e+00 : f32
    %19 = vector.broadcast %cst : f32 to vector<1x256xf32>
    %20 = arith.select %17, %18, %19 : vector<1x256xi1>, vector<1x256xf32>
    %21 = vector.extract_strided_slice %1 {offsets = [1, 0], sizes = [1, 256], strides = [1, 1]} : vector<4x256xf32> to vector<1x256xf32>
    %22 = arith.subf %21, %12 : vector<1x256xf32>
    %23 = math.exp %22 : vector<1x256xf32>
    %24 = arith.addf %15, %23 : vector<1x256xf32>
    %c1_i32 = arith.constant 1 : i32
    %25 = vector.broadcast %c1_i32 : i32 to vector<1x256xi32>
    %26 = arith.cmpi eq, %3, %25 : vector<1x256xi32>
    %cst_5 = arith.constant 0.000000e+00 : f32
    %27 = vector.broadcast %cst_5 : f32 to vector<1x256xf32>
    %28 = arith.select %26, %21, %27 : vector<1x256xi1>, vector<1x256xf32>
    %29 = arith.addf %20, %28 : vector<1x256xf32>
    %30 = vector.extract_strided_slice %1 {offsets = [2, 0], sizes = [1, 256], strides = [1, 1]} : vector<4x256xf32> to vector<1x256xf32>
    %31 = arith.subf %30, %12 : vector<1x256xf32>
    %32 = math.exp %31 : vector<1x256xf32>
    %33 = arith.addf %24, %32 : vector<1x256xf32>
    %c2_i32 = arith.constant 2 : i32
    %34 = vector.broadcast %c2_i32 : i32 to vector<1x256xi32>
    %35 = arith.cmpi eq, %3, %34 : vector<1x256xi32>
    %cst_6 = arith.constant 0.000000e+00 : f32
    %36 = vector.broadcast %cst_6 : f32 to vector<1x256xf32>
    %37 = arith.select %35, %30, %36 : vector<1x256xi1>, vector<1x256xf32>
    %38 = arith.addf %29, %37 : vector<1x256xf32>
    %39 = vector.extract_strided_slice %1 {offsets = [3, 0], sizes = [1, 256], strides = [1, 1]} : vector<4x256xf32> to vector<1x256xf32>
    %40 = arith.subf %39, %12 : vector<1x256xf32>
    %41 = math.exp %40 : vector<1x256xf32>
    %42 = arith.addf %33, %41 : vector<1x256xf32>
    %c3_i32 = arith.constant 3 : i32
    %43 = vector.broadcast %c3_i32 : i32 to vector<1x256xi32>
    %44 = arith.cmpi eq, %3, %43 : vector<1x256xi32>
    %cst_7 = arith.constant 0.000000e+00 : f32
    %45 = vector.broadcast %cst_7 : f32 to vector<1x256xf32>
    %46 = arith.select %44, %39, %45 : vector<1x256xi1>, vector<1x256xf32>
    %47 = arith.addf %38, %46 : vector<1x256xf32>
    %48 = math.log %42 : vector<1x256xf32>
    %49 = arith.addf %12, %48 : vector<1x256xf32>
    %50 = arith.subf %49, %47 : vector<1x256xf32>
    %cst_8 = arith.constant 0.000000e+00 : f32
    %51 = vector.broadcast %cst_8 : f32 to vector<1x256xf32>
    %52 = arith.select %5, %50, %51 : vector<1x256xi1>, vector<1x256xf32>
    %53 = vector.shape_cast %52 : vector<1x256xf32> to vector<1x1x256xf32>
    %cst_9 = arith.constant dense<0.000000e+00> : vector<1xf32>
    %54 = vector.multi_reduction <add>, %53, %cst_9 [1, 2] : vector<1x1x256xf32> to vector<1xf32>
    %55 = vector.shape_cast %54 : vector<1xf32> to vector<1x1x1xf32>
    %56 = vector.extract %55[0, 0, 0] : f32 from vector<1x1x1xf32>
    %57 = arith.extui %5 : vector<1x256xi1> to vector<1x256xi32>
    %58 = arith.sitofp %57 : vector<1x256xi32> to vector<1x256xf32>
    %59 = vector.shape_cast %58 : vector<1x256xf32> to vector<1x1x256xf32>
    %cst_10 = arith.constant dense<0.000000e+00> : vector<1xf32>
    %60 = vector.multi_reduction <add>, %59, %cst_10 [1, 2] : vector<1x1x256xf32> to vector<1xf32>
    %61 = vector.shape_cast %60 : vector<1xf32> to vector<1x1x1xf32>
    %62 = vector.extract %61[0, 0, 0] : f32 from vector<1x1x1xf32>
    %63 = tpu.iota {dimensions = array<i32: 0>} : vector<8x128xi32>
    %64 = tpu.iota {dimensions = array<i32: 1>} : vector<8x128xi32>
    %c0_i32_11 = arith.constant 0 : i32
    %65 = vector.broadcast %c0_i32_11 : i32 to vector<8x128xi32>
    %66 = arith.cmpi eq, %63, %65 : vector<8x128xi32>
    %c0_i32_12 = arith.constant 0 : i32
    %67 = vector.broadcast %c0_i32_12 : i32 to vector<8x128xi32>
    %68 = arith.cmpi eq, %64, %67 : vector<8x128xi32>
    %69 = arith.andi %66, %68 : vector<8x128xi1>
    %cst_13 = arith.constant 0.000000e+00 : f32
    %70 = vector.broadcast %56 : f32 to vector<8x128xf32>
    %71 = vector.broadcast %cst_13 : f32 to vector<8x128xf32>
    %72 = arith.select %69, %70, %71 : vector<8x128xi1>, vector<8x128xf32>
    %c0_14 = arith.constant 0 : index
    %c0_15 = arith.constant 0 : index
    %73 = vector.load %arg4[%c0_14, %c0_15] : memref<8x128xf32, #tpu.memory_space<vmem>>, vector<8x128xf32>
    tpu.vector_store %arg4[%c0_14, %c0_15], %72 {strides = array<i32>} : memref<8x128xf32, #tpu.memory_space<vmem>>, vector<8x128xf32>,
    %cst_16 = arith.constant 0.000000e+00 : f32
    %74 = vector.broadcast %62 : f32 to vector<8x128xf32>
    %75 = vector.broadcast %cst_16 : f32 to vector<8x128xf32>
    %76 = arith.select %69, %74, %75 : vector<8x128xi1>, vector<8x128xf32>
    %c0_17 = arith.constant 0 : index
    %c0_18 = arith.constant 0 : index
    %77 = vector.load %arg5[%c0_17, %c0_18] : memref<8x128xf32, #tpu.memory_space<vmem>>, vector<8x128xf32>
    tpu.vector_store %arg5[%c0_17, %c0_18], %76 {strides = array<i32>} : memref<8x128xf32, #tpu.memory_space<vmem>>, vector<8x128xf32>,
    return
  }
  func.func @transform_0(%arg0: i32, %arg1: i32) -> (i32, i32, i32) {
    %c0_i32 = arith.constant 0 : i32
    %c0_i32_0 = arith.constant 0 : i32
    return %arg0, %c0_i32, %arg1 : i32, i32, i32
  }
  func.func @transform_1(%arg0: i32, %arg1: i32) -> (i32, i32, i32) {
    %c0_i32 = arith.constant 0 : i32
    %c0_i32_0 = arith.constant 0 : i32
    return %arg0, %c0_i32, %arg1 : i32, i32, i32
  }
  func.func @transform_2(%arg0: i32, %arg1: i32) -> (i32, i32) {
    %c0_i32 = arith.constant 0 : i32
    return %arg0, %arg1 : i32, i32
  }
  func.func @transform_3(%arg0: i32, %arg1: i32) -> (i32, i32) {
    %c0_i32 = arith.constant 0 : i32
    return %arg0, %arg1 : i32, i32
  }
}

</mosaic_0001>

<bundles_post_ra>
// kernel: cross_entropy_loss_2d.1
= control target key start
LH: loop header
LB: loop body
LE: loop exit
PB: predicated region body
PF: predicated region fallthrough
CT: control target
= control target key end

     0   :  { %s637_s12 = smov 0   ;;  %s639_s13 = smov 0   ;;  %s687_s0 = inlined_call_operand.vmem [shape: f32[2,4,256], index: 0, kind: input, shape index: {}]   ;;  %s688_s1 = inlined_call_operand.vmem [shape: s32[2,1,256], index: 1, kind: input, shape index: {}]   ;;  %s689_s2 = inlined_call_operand.vmem [shape: f32[16,128], index: 2, kind: output, shape index: {0}]   ;;  %s690_s3 = inlined_call_operand.vmem [shape: f32[16,128], index: 3, kind: output, shape index: {1}]  }
   0x1   :  { %s641_s14 = smov 0  }
   0x2 LB: > { %s26_s15 = sadd.s32 1, %s609_s13  ;;  %p535_p0 = scmp.ge.s32.totalorder %s613_s14, 1  ;;  %s613_s14 = sphi %s641_s14, %s14_s14   ;;  %s609_s13 = sphi %s639_s13, %s692_s13   ;;  %s605_s12 = sphi %s637_s12, %s691_s12  }
   0x3   : > { %p28_p1 = scmp.ge.s32.totalorder %s26_s15, 2  ;;  %p179_p2 = scmp.lt.s32.totalorder %s613_s14, 3 }
   0x5   : > { %s694_s15 = smov (%p28_p1, %s26_s15), 0  ;;  %p180_p3 = pnand %p535_p0, %p179_p2 }
   0x6   : > { %p225_p4 = scmp.lt.s32.totalorder (!%p180_p3), %s605_s12, 1 }
   0x7   : > { %183 = sbr.rel (%p180_p3) target bundleno = 256 (0x100), region = 28 }
   0xc   : > { %s696_s12 = smov (!%p225_p4, %s605_s12), 1  ;;  %vm278_vm0 = vcmask 1040384   ;;  %v615_v39 = vmov 286326784   ;;  %v616_v52 = vmov 0.0  }
   0xd   : > { %s655_s16 = sshll.u32 %s696_s12, 3  ;;  %s538_s20 = sshll.u32 %s696_s12, 1  ;;  %v339_v40 = vunpack.c.l.s4 %v615_v39 }
   0xe   : > { %s232_s19 = scalar_lea.vmem %s687_s0, %s655_s16  ;;  %s241_s23 = scalar_lea.vmem %s688_s1, %s538_s20 }
   0xf   : > { %v257_v0 = vld [vmem:[%s232_s19] sm:$0xff]  ;;  %v340_v43 = vunpack.c.0.s8 %v339_v40  ;;  %s249_s26 = scalar_lea.vmem %s689_s2, %s655_s16  ;;  %s256_s30 = scalar_lea.vmem %s690_s3, %s655_s16 }
  0x10   : > { %v541_v1 = vrot.slane %v257_v0, 9  ;;  %v542_v2 = vrot.slane %v257_v0, 10  ;;  %294 = vst [vmem:[#allocation1] sm:$0xff] %v257_v0  ;;  %v543_v4 = vrot.slane %v257_v0, 11  ;;  %v277_v19 = vrot.slane %v257_v0, 3 }
  0x11   : > { %v258_v20 = vld [vmem:[%s241_s23] sm:$0x3] }
  0x12   : > { %v264_v3 = vmax.f32 %v257_v0, %v541_v1  ;;  %vm276_vm1 = vcmp.eq.s32.totalorder %v258_v20, 0  ;;  %v279_v22 = vsel %vm278_vm0, %v257_v0, %v277_v19  ;;  %vm293_vm2 = vcmp.eq.s32.totalorder %v258_v20, 1 }
  0x13   : > { %v281_v26 = vsel %vm276_vm1, %v279_v22, 0.0  ;;  %vm310_vm3 = vcmp.eq.s32.totalorder %v258_v20, 2  ;;  %vm327_vm4 = vcmp.eq.s32.totalorder %v258_v20, 3  ;;  %vm259_vm5 = vcmp.ne.s32.totalorder %v258_v20, 255 }
  0x14   : > { %v268_v5 = vmax.f32 %v264_v3, %v542_v2  ;;  %v547_v53 = vsel %vm259_vm5, 1.0, %v616_v52 }
  0x15   : > { %v369_v58 = vperm.slane %v547_v53, 0  ;;  %v370_v59 = vperm.slane %v547_v53, 1 }
  0x16   : > { %v272_v6 = vmax.f32 %v268_v5, %v543_v4 }
  0x17   : > { %v296_v7 = vld [vmem:[#allocation1 + $0x1] ss:$4 sm:$0xff]  ;;  %v373_v61 = vsel %vm278_vm0, %v369_v58, 0.0  ;;  %v374_v62 = vsel %vm278_vm0, %v370_v59, 0.0 }
  0x18   : > { %v273_v8 = vsub.f32 %v257_v0, %v272_v6  ;;  %v283_v9 = vrot.slane %v272_v6, 7  ;;  %v300_v10 = vrot.slane %v272_v6, 6  ;;  %311 = vst [vmem:[#allocation1] sm:$0xff] %v257_v0  ;;  %v317_v11 = vrot.slane %v272_v6, 5 }
  0x19   : > { %v298_v28 = vsel %vm293_vm2, %v296_v7, 0.0  ;;  %v375_v63 = vadd.f32 %v374_v62, %v373_v61 }
  0x1a   : > { %v274_v12 = vmul.f32 1.442695, %v273_v8  ;;  %v285_v13 = vsub.f32 %v257_v0, %v283_v9  ;;  %v302_v14 = vsub.f32 %v257_v0, %v300_v10  ;;  %v319_v15 = vsub.f32 %v257_v0, %v317_v11 }
  0x1b   : > { %v299_v33 = vadd.f32 %v298_v28, %v281_v26 }
  0x1c   : > { %v286_v16 = vmul.f32 1.442695, %v285_v13  ;;  %v303_v17 = vmul.f32 1.442695, %v302_v14  ;;  %581 = vpow2.f32 %v274_v12  ;;  %v320_v18 = vmul.f32 1.442695, %v319_v15 }
  0x1d   : > { %v385_v14 = vlaneseq }
  0x1e   : > { %583 = vpow2.f32 %v286_v16 }
  0x1f   : > { %585 = vpow2.f32 %v303_v17  ;;  %v313_v21 = vld [vmem:[#allocation1 + $0x2] ss:$4 sm:$0xff]  ;;  %v386_v15 = vshrl.u32 %v385_v14, 7  ;;  %v388_v16 = vand.u32 127, %v385_v14 }
  0x20   : > { %587 = vpow2.f32 %v320_v18  ;;  %328 = vst [vmem:[#allocation1] sm:$0xff] %v257_v0  ;;  %v315_v35 = vsel %vm310_vm3, %v313_v21, 0.0 }
  0x21   : > { %v316_v38 = vadd.f32 %v315_v35, %v299_v33  ;;  %vm389_vm6 = vcmp.eq.s32.totalorder %v386_v15, 0  ;;  %vm390_vm7 = vcmp.eq.s32.totalorder %v388_v16, 0 }
  0x22   : > { %v582_v23 = vpop.eup %581  ;;  %vm391_vm8 = vmand %vm389_vm6, %vm390_vm7 }
  0x24   : > { %v584_v24 = vpop.eup %583 }
  0x25   : > { %v586_v25 = vpop.eup %585  ;;  %v544_v27 = vrot.slane %v584_v24, 9 }
  0x26   : > { %v588_v29 = vpop.eup %587  ;;  %v545_v30 = vrot.slane %v586_v25, 10 }
  0x27   : > { %v292_v31 = vadd.f32 %v582_v23, %v544_v27  ;;  %v546_v32 = vrot.slane %v588_v29, 11  ;;  %v330_v36 = vld [vmem:[#allocation1 + $0x3] ss:$4 sm:$0xff] }
  0x28   : > { %v332_v41 = vsel %vm327_vm4, %v330_v36, 0.0 }
  0x29   : > { %v309_v34 = vadd.f32 %v545_v30, %v292_v31  ;;  %v333_v42 = vadd.f32 %v332_v41, %v316_v38 }
  0x2b   : > { %v326_v37 = vadd.f32 %v546_v32, %v309_v34  ;;  %v341_v46 = vperm.slane %v333_v42, %v340_v43 }
  0x2d   : > { %589 = vlog2.f32 %v326_v37 }
  0x33   : > { %v590_v44 = vpop.eup %589 }
  0x34   : > { %v335_v45 = vmul.f32 0.6931472, %v590_v44 }
  0x36   : > { %v336_v47 = vadd.f32 %v335_v45, %v272_v6 }
  0x38   : > { %v343_v48 = vsub.f32 %v336_v47, %v341_v46 }
  0x3a   : > { %v345_v49 = vrot.slane %v343_v48, 3 }
  0x3c   : > { %v346_v50 = vsel %vm278_vm0, %v343_v48, %v345_v49 }
  0x3d   : > { %v348_v51 = vsel %vm259_vm5, %v346_v50, 0.0 }
  0x3e   : > { %v350_v54 = vperm.slane %v348_v51, 0  ;;  %v351_v55 = vperm.slane %v348_v51, 1 }
  0x40   : > { %v354_v56 = vsel %vm278_vm0, %v350_v54, 0.0  ;;  %v355_v57 = vsel %vm278_vm0, %v351_v55, 0.0 }
  0x41   : > { %v356_v60 = vadd.f32 %v355_v57, %v354_v56 }
  0x43   : > { %357 = vadd.xlane.f32.xlu0 %v356_v60 }
  0x4b   : > { %376 = vadd.xlane.f32.xlu0 %v375_v63 }
  0xb6   : > { %v358_v0 = vpop.xlane.xlu0 %357 }
  0xb7   : > { %v359_v1 = vrot.slane %v358_v0, 4 }
  0xb9   : > { %v360_v2 = vadd.f32 %v359_v1, %v358_v0 }
  0xbb   : > { %v361_v3 = vrot.slane %v360_v2, 2 }
  0xbd   : > { %v362_v4 = vadd.f32 %v361_v3, %v360_v2 }
  0xbe   : > { %v377_v5 = vpop.xlane.xlu0 %376 }
  0xbf   : > { %v378_v6 = vrot.slane %v377_v5, 4  ;;  %v363_v7 = vrot.slane %v362_v4, 1 }
  0xc1   : > { %v379_v8 = vadd.f32 %v378_v6, %v377_v5  ;;  %v364_v9 = vadd.f32 %v363_v7, %v362_v4 }
  0xc3   : > { %v380_v10 = vrot.slane %v379_v8, 2  ;;  %551 = vpush %v364_v9 }
  0xc5   : > { %v381_v11 = vadd.f32 %v380_v10, %v379_v8 }
  0xc7   : > { %v382_v12 = vrot.slane %v381_v11, 1 }
  0xc9   : > { %v383_v13 = vadd.f32 %v382_v12, %v381_v11 }
  0xcb   : > { %553 = vpush %v383_v13 }
  0xf4   : > { %s552_s27 = spop %551 }
  0xf5   : > { %v392_v17 = vstv %s552_s27 }
  0xf6   : > { %v393_v18 = vsel %vm391_vm8, %v392_v17, 0.0 }
  0xf7   : > { %394 = vst [vmem:[%s249_s26] sm:$0xff] %v393_v18 }
  0xfc   : > { %s554_s4 = spop %553 }
  0xfd   : > { %v395_v19 = vstv %s554_s4 }
  0xfe   : > { %v396_v20 = vsel %vm391_vm8, %v395_v19, 0.0 }
  0xff   : > { %397 = vst [vmem:[%s256_s30] sm:$0xff] %v396_v20 }
 0x100 PF: > { %s14_s14 = sadd.s32 1, %s613_s14   ;;  %s691_s12 = smov %s609_s13 }
 0x101   : > { %p11_p5 = scmp.ge.s32.totalorder %s14_s14, 4   ;;  %s692_s13 = smov %s694_s15 }
 0x103   :  { %13 = sbr.rel (!%p11_p5) target bundleno = 2 (0x2), region = 76 }

</bundles_post_ra>
